<compile_context>
chip_gen: v5e
topology: v5e:2x2
jax: 0.10.0
libtpu: 0.0.40
codegen_flags: <defaults>
</compile_context>

<pallas_src>
import jax
import jax.numpy as jnp
from jax.experimental import pallas as pl
from jax.experimental.pallas import tpu as pltpu


def _taylor_mask_kernel(x_ref, m_ref, o_ref):
    # x_ref: (TR, L), m_ref: (1, L) -> lane-dense broadcast multiply on the VPU.
    o_ref[...] = x_ref[...] * m_ref[...]


def taylor_mask_forward(image, pruned):
    """image: (B, C, H, W) float; pruned: (W,) bool.  Returns image * mask."""
    B, C, H, W = image.shape
    dtype = image.dtype
    itemsize = jnp.dtype(dtype).itemsize

    # Build the mask in plain JAX (glue / parameter setup), same dtype as the
    # image, and tile it along H so it lines up with the lane-dense H*W axis.
    mask = jnp.where(pruned, jnp.zeros((), dtype), jnp.ones((), dtype))  # (W,)
    L = H * W
    mask2d = jnp.tile(mask, H).reshape(1, L)                             # (1, L)

    rows = B * C
    x2d = image.reshape(rows, L)   # lane axis = H*W  (lane-dense slab)

    # Sublane granularity depends on dtype packing (8 for 32-bit, 16 for bf16).
    sublane = max(8, 32 // itemsize)

    # Target ~2 MiB per block: double-buffered input + output ~= 8 MiB resident,
    # comfortably inside the 32 MiB scoped-VMEM default on all chip generations
    # while amortizing the ~0.35 us per-grid-step overhead.
    target_block_bytes = 2 * 1024 * 1024
    fit_rows = max(1, target_block_bytes // (L * itemsize))
    if fit_rows >= rows:
        tr = rows                                  # whole slab in one row-block
    else:
        tr = max(sublane, (fit_rows // sublane) * sublane)

    # Pad rows up to a multiple of tr so every grid step writes a full block.
    rows_p = pl.cdiv(rows, tr) * tr
    if rows_p != rows:
        x2d = jnp.pad(x2d, ((0, rows_p - rows), (0, 0)))
    grid = (rows_p // tr,)

    cost = pl.CostEstimate(
        flops=rows_p * L,
        transcendentals=0,
        bytes_accessed=2 * rows_p * L * itemsize + L * itemsize,
    )

    out2d = pl.pallas_call(
        _taylor_mask_kernel,
        out_shape=jax.ShapeDtypeStruct((rows_p, L), dtype),
        grid_spec=pl.GridSpec(
            grid=grid,
            in_specs=[
                pl.BlockSpec((tr, L), lambda i: (i, 0)),   # image rows (lane-dense)
                pl.BlockSpec((1, L), lambda i: (0, 0)),    # broadcast mask row
            ],
            out_specs=pl.BlockSpec((tr, L), lambda i: (i, 0)),
        ),
        compiler_params=pltpu.CompilerParams(
            dimension_semantics=("parallel",),
            vmem_limit_bytes=32 * 1024 * 1024,
        ),
        cost_estimate=cost,
    )(x2d, mask2d)

    if rows_p != rows:
        out2d = out2d[:rows]
    return out2d.reshape(B, C, H, W)


if __name__ == "__main__":
    key = jax.random.PRNGKey(0)
    B, C, H, W = 2, 4, 16, 16

    image = jax.random.normal(key, (B, C, H, W), dtype=jnp.float32)

    # Deterministic "pruned" buffer (module initializes it to all-False; we
    # prune a few lanes so the kernel does something visible).
    pruned = jnp.zeros((W,), dtype=bool).at[jnp.array([1, 5, 9])].set(True)

    out = taylor_mask_forward(image, pruned)
    out = jax.block_until_ready(out)

    # Reference check in plain JAX.
    mask_ref = jnp.where(pruned, 0.0, 1.0).astype(image.dtype)
    ref = image * mask_ref[None, None, None, :]
    assert jnp.allclose(out, ref), "mismatch vs reference"

    # TODO(synk): backward hook (grad**2 accumulation) and prune() top-k
    # bookkeeping are training-time side effects, not part of the forward path.
    print("KERNEL_OK")
</pallas_src>

<mosaic_0001>
module attributes {stable_mosaic.version = 11 : i64} {
  func.func @_taylor_mask_kernel(%arg0: i32, %arg1: memref<8x256xf32, #tpu.memory_space<vmem>>, %arg2: memref<1x256xf32, #tpu.memory_space<vmem>>, %arg3: memref<8x256xf32, #tpu.memory_space<vmem>>) attributes {dimension_semantics = [#tpu.dimension_semantics<parallel>], iteration_bounds = array<i64: 1>, scalar_prefetch = 0 : i64, scratch_operands = 0 : i64, tpu.core_type = #tpu.core_type<tc>, window_params = [{transform_indices = @transform_0, window_bounds = array<i64: 8, 256>}, {pipeline_mode = #tpu.pipeline_mode<synchronous>, transform_indices = @transform_1, window_bounds = array<i64: 1, 256>}, {transform_indices = @transform_2, window_bounds = array<i64: 8, 256>}]} {
    %c0 = arith.constant 0 : index
    %c0_0 = arith.constant 0 : index
    %0 = vector.load %arg1[%c0, %c0_0] : memref<8x256xf32, #tpu.memory_space<vmem>>, vector<8x256xf32>
    %c0_1 = arith.constant 0 : index
    %c0_2 = arith.constant 0 : index
    %1 = vector.load %arg2[%c0_1, %c0_2] : memref<1x256xf32, #tpu.memory_space<vmem>>, vector<1x256xf32>
    %2 = vector.broadcast %1 : vector<1x256xf32> to vector<8x256xf32>
    %3 = arith.mulf %0, %2 : vector<8x256xf32>
    %c0_3 = arith.constant 0 : index
    %c0_4 = arith.constant 0 : index
    %4 = vector.load %arg3[%c0_3, %c0_4] : memref<8x256xf32, #tpu.memory_space<vmem>>, vector<8x256xf32>
    tpu.vector_store %arg3[%c0_3, %c0_4], %3 {strides = array<i32>} : memref<8x256xf32, #tpu.memory_space<vmem>>, vector<8x256xf32>,
    return
  }
  func.func @transform_0(%arg0: i32) -> (i32, i32) {
    %c0_i32 = arith.constant 0 : i32
    %c0_i32_0 = arith.constant 0 : i32
    return %arg0, %c0_i32 : i32, i32
  }
  func.func @transform_1(%arg0: i32) -> (i32, i32) {
    %c0_i32 = arith.constant 0 : i32
    %c0_i32_0 = arith.constant 0 : i32
    %c0_i32_1 = arith.constant 0 : i32
    return %c0_i32, %c0_i32_0 : i32, i32
  }
  func.func @transform_2(%arg0: i32) -> (i32, i32) {
    %c0_i32 = arith.constant 0 : i32
    %c0_i32_0 = arith.constant 0 : i32
    return %arg0, %c0_i32 : i32, i32
  }
}

</mosaic_0001>

<bundles_post_ra>
// kernel: tpu_custom_call.1
= control target key start
LH: loop header
LB: loop body
LE: loop exit
PB: predicated region body
PF: predicated region fallthrough
CT: control target
= control target key end

     0   :  { %7 = vsyncpa [#allocation3], 0  ;;  %s178_s0 = inlined_call_operand.hbm [shape: f32[8,256], index: 0, kind: input, shape index: {}]   ;;  %s179_s1 = inlined_call_operand.hbm [shape: f32[1,256], index: 1, kind: input, shape index: {}]   ;;  %s180_s2 = inlined_call_operand.hbm [shape: f32[8,256], index: 2, kind: output, shape index: {}]  }
   0x1   :  { %8 = vsyncpa [#allocation6], 0 }
   0x2   :  { %9 = vsyncpa [#allocation4], 0  ;;  %s15_s11 = sshll.u32 %s178_s0, 4  ;;  %s151_s12 = smov [#allocation2]   ;;  %s16_s11 = int_to_ptr.hbm [resolvable:$true] %s15_s11 }
   0x3   :  { %s17_s13 = sshll.u32 %s151_s12, 4  ;;  %s26_s16 = sshll.u32 %s179_s1, 4  ;;  %s18_s13 = int_to_ptr.vmem [resolvable:$true] %s17_s13  ;;  %s27_s16 = int_to_ptr.hbm [resolvable:$true] %s26_s16 }
   0x4   :  { %20 = dma.hbm_to_vmem [thread:$0]  %s16_s11, 256, %s18_s13, [#allocation3]  }
   0x5   :  { %s152_s17 = smov [#allocation5]  }
   0x6   :  { %s28_s18 = sshll.u32 %s152_s17, 4  ;;  %s29_s18 = int_to_ptr.vmem [resolvable:$true] %s28_s18 }
   0x7   :  { %31 = dma.hbm_to_vmem [thread:$0]  %s27_s16, 32, %s29_s18, [#allocation6]  }
   0x8   :  { %145 = dma.done.wait [#allocation3], 256  }
   0x9   :  { %146 = vsyncadd [#allocation3], 4294967040 }
   0xa   :  { %147 = dma.done.wait [#allocation6], 32  }
   0xb   :  { %148 = vsyncadd [#allocation6], 4294967264  ;;  %v40_v0 = vld [vmem:[#allocation2] sm:$0xff]  ;;  %v42_v1 = vld [vmem:[#allocation5] sm:$0x3]  ;;  %s153_s0 = smov [#allocation7]  }
   0xc   :  { %v41_v2 = vld [vmem:[#allocation2 + $0x8] sm:$0xff]  ;;  %v44_v3 = vperm.slane %v42_v1, 0  ;;  %v45_v4 = vperm.slane %v42_v1, 1  ;;  %s57_s19 = sshll.u32 %s153_s0, 4  ;;  %s59_s1 = sshll.u32 %s180_s2, 4  ;;  %s58_s19 = int_to_ptr.vmem [resolvable:$true] %s57_s19  ;;  %s60_s1 = int_to_ptr.hbm [resolvable:$true] %s59_s1 }
   0xe   :  { %v48_v5 = vmul.f32 %v44_v3, %v40_v0  ;;  %v49_v6 = vmul.f32 %v45_v4, %v41_v2 }
  0x10   :  { %50 = vst [vmem:[#allocation7] sm:$0xff] %v48_v5 }
  0x11   :  { %51 = vst [vmem:[#allocation7 + $0x8] sm:$0xff] %v49_v6 }
  0x12   :  { %62 = dma.vmem_to_hbm [thread:$0]  %s58_s19, 256, %s60_s1, [#allocation4]  }
  0x13   :  { %149 = dma.done.wait [#allocation4], 256  }
  0x14   :  { %150 = vsyncadd [#allocation4], 4294967040 }
  0x15   :  { %67 = vsyncpa [#allocation3], 1 }
  0x16   :  { %68 = vsyncpa [#allocation6], 1 }
  0x17   :  { %69 = vsyncpa [#allocation4], 1 }

</bundles_post_ra>
